<compile_context>
chip_gen: v7x
topology: tpu7x:2x2x1
jax: 0.10.0
libtpu: 0.0.40
codegen_flags: <defaults>
</compile_context>

<pallas_src>
import functools

import jax
import jax.numpy as jnp
from jax.experimental import pallas as pl
from jax.experimental.pallas import tpu as pltpu


def _pick_row_block(Ho, Wo):
    """Largest proper divisor TH of Ho whose flattened row block TH*Wo is a multiple
    of 128 (lane-dense, unmasked stores).  Falls back to the full height (single
    block, legal because the block then equals the full array dims)."""
    for th in range(Ho - 1, 0, -1):
        if Ho % th == 0 and (th * Wo) % 128 == 0:
            return th
    return Ho


def _tile_bytes(rows, cols, itemsize):
    """Bytes of a (rows, cols) slab after (8, 128) tile padding."""
    return ((rows + 7) // 8 * 8) * ((cols + 127) // 128 * 128) * itemsize


def _sepconv_kernel(x_ref, wd_ref, wp_ref, o_ref, *scratch,
                    kpad, TH, Wo, KH, KW):
    # x_ref : (1, C, Hin, Win)  one (un-padded) NCHW image
    # wd_ref: (KH*KW, C)        depthwise weights, tap-major
    # wp_ref: (Cout, C)         pointwise (1x1 conv) weights
    # o_ref : (1, Cout, TH*Wo)  lane-dense output row block (flattened spatial)
    # scratch[0] (if kpad>0): (C, Hin+2*kpad, Win+2*kpad) zero-padded image in VMEM
    C, Hin, Win = x_ref.shape[1], x_ref.shape[2], x_ref.shape[3]
    r = pl.program_id(1)                       # row-block index
    row0 = pl.multiple_of(r * TH, TH)          # first output row of this block

    if kpad > 0:
        # Fused zero padding: zero the scratch, copy the interior, read taps from it.
        pad_ref = scratch[0]
        pad_ref[...] = jnp.zeros_like(pad_ref)
        pad_ref[:, kpad:kpad + Hin, kpad:kpad + Win] = x_ref[0]

        def tap(kh, kw):                       # shifted load straight from the ref
            return pad_ref[:, pl.ds(row0 + kh, TH), kw:kw + Wo]
    else:
        def tap(kh, kw):
            return x_ref[0, :, pl.ds(row0 + kh, TH), kw:kw + Wo]

    # Depthwise conv: per-tap shifted load * per-channel weight, f32 accumulation (VPU).
    acc = jnp.zeros((C, TH, Wo), dtype=jnp.float32)
    for kh in range(KH):                       # small static loops, fully unrolled
        for kw in range(KW):
            w_tap = wd_ref[kh * KW + kw, :].astype(jnp.float32)      # (C,)
            acc = acc + tap(kh, kw).astype(jnp.float32) * w_tap[:, None, None]

    # Pointwise 1x1 conv as (Cout, C) @ (C, TH*Wo): output is spatial-minor, i.e.
    # lane-dense along TH*Wo, and lands directly in NCHW order.
    acc2 = acc.reshape(C, TH * Wo)
    out = jnp.dot(wp_ref[...].astype(jnp.float32), acc2,
                  preferred_element_type=jnp.float32)                # (Cout, TH*Wo)
    o_ref[0] = out.astype(o_ref.dtype)


def separable_conv2d(x_nchw, w_depthwise, w_pointwise, padding, padding_mode="zeros"):
    """Forward pass of SeparableConv2d (stride=1, dilation=1, bias=False).

    x_nchw:       (N, C, H, W)       -- PyTorch input layout (kept as-is)
    w_depthwise:  (C, 1, KH, KW)     -- nn.Conv2d(C, C, k, groups=C).weight
    w_pointwise:  (Cout, C, 1, 1)    -- nn.Conv2d(C, Cout, 1).weight
    returns:      (N, Cout, H', W')  -- PyTorch NCHW output
    """
    N, C, H, W = x_nchw.shape
    KH, KW = int(w_depthwise.shape[2]), int(w_depthwise.shape[3])
    Cout = int(w_pointwise.shape[0])
    assert w_depthwise.shape[0] == C and w_depthwise.shape[1] == 1
    assert w_pointwise.shape[1] == C
    assert padding_mode in ("zeros", "reflect", "replicate", "circular")

    # Zero padding is done inside the kernel.  Other modes fall back to a wrapper pad.
    if padding_mode == "zeros" or padding == 0:
        x_in, kpad = x_nchw, int(padding)
    else:
        mode = {"reflect": "reflect", "replicate": "edge", "circular": "wrap"}[padding_mode]
        pad_cfg = ((0, 0), (0, 0), (padding, padding), (padding, padding))
        x_in, kpad = jnp.pad(x_nchw, pad_cfg, mode=mode), 0

    Hin, Win = int(x_in.shape[2]), int(x_in.shape[3])
    Hp, Wp = Hin + 2 * kpad, Win + 2 * kpad
    Ho, Wo = Hp - KH + 1, Wp - KW + 1                       # output spatial size

    # Tiny weight re-layouts (O(C*KH*KW) elements, negligible).
    wd2 = jnp.transpose(w_depthwise.reshape(C, KH * KW), (1, 0))   # (KH*KW, C)
    wp2 = w_pointwise.reshape(Cout, C)                             # (Cout, C)

    TH = _pick_row_block(Ho, Wo)
    R = Ho // TH
    itemsize = x_in.dtype.itemsize

    # VMEM budget: 2x double-buffered input & output blocks + padded scratch + weights
    # + live f32 accumulators; cap well under v7x's 64 MiB physical VMEM.
    est = (2 * C * _tile_bytes(Hin, Win, itemsize)
           + 2 * _tile_bytes(Cout, TH * Wo, itemsize)
           + (C * _tile_bytes(Hp, Wp, itemsize) if kpad > 0 else 0)
           + _tile_bytes(KH * KW, C, 4) + _tile_bytes(Cout, C, 4)
           + C * _tile_bytes(TH, Wo, 4) + _tile_bytes(Cout, TH * Wo, 4))
    vmem_limit = int(min(64 * 2**20, max(16 * 2**20, 2 * est)))

    scratch = [pltpu.VMEM((C, Hp, Wp), x_in.dtype)] if kpad > 0 else []
    kernel = functools.partial(_sepconv_kernel, kpad=kpad, TH=TH, Wo=Wo, KH=KH, KW=KW)

    out_flat = pl.pallas_call(
        kernel,
        out_shape=jax.ShapeDtypeStruct((N, Cout, Ho * Wo), x_nchw.dtype),
        grid_spec=pltpu.PrefetchScalarGridSpec(
            num_scalar_prefetch=0,
            grid=(N, R),
            in_specs=[
                # Full image per batch element; block index does not depend on r,
                # so Pallas keeps it resident across the row-block axis.
                pl.BlockSpec((1, C, Hin, Win), lambda n, r: (n, 0, 0, 0)),
                pl.BlockSpec((KH * KW, C), lambda n, r: (0, 0)),
                pl.BlockSpec((Cout, C), lambda n, r: (0, 0)),
            ],
            out_specs=pl.BlockSpec((1, Cout, TH * Wo), lambda n, r: (n, 0, r)),
            scratch_shapes=scratch,
        ),
        compiler_params=pltpu.CompilerParams(
            dimension_semantics=("parallel", "parallel"),
            vmem_limit_bytes=vmem_limit,
        ),
    )(x_in, wd2, wp2)

    # Contiguous reshape back to (N, Cout, Ho, Wo): free, already NCHW -- no transpose.
    return out_flat.reshape(N, Cout, Ho, Wo)


def _reference(x_nchw, w_depthwise, w_pointwise, padding, padding_mode="zeros"):
    """Pure-JAX reference using lax.conv_general_dilated (matches PyTorch Conv2d)."""
    C = x_nchw.shape[1]
    assert padding_mode == "zeros"  # reference check only for zero padding
    dw = jax.lax.conv_general_dilated(
        x_nchw, w_depthwise,
        window_strides=(1, 1),
        padding=[(padding, padding), (padding, padding)],
        dimension_numbers=("NCHW", "OIHW", "NCHW"),
        feature_group_count=C)
    pw = jax.lax.conv_general_dilated(
        dw, w_pointwise,
        window_strides=(1, 1),
        padding=[(0, 0), (0, 0)],
        dimension_numbers=("NCHW", "OIHW", "NCHW"))
    return pw


if __name__ == "__main__":
    # Module config (small, consistent with the forward pass)
    in_channels, out_channels = 4, 8
    kernel_size, padding, padding_mode = 3, 1, "zeros"
    N, H, W = 2, 16, 16

    key = jax.random.PRNGKey(0)
    k_x, k_dw, k_pw = jax.random.split(key, 3)

    x = jax.random.normal(k_x, (N, in_channels, H, W), dtype=jnp.float32)
    # Deterministic "Kaiming-ish" scaled weights (shapes match nn.Conv2d weights).
    w_dw = jax.random.normal(
        k_dw, (in_channels, 1, kernel_size, kernel_size), dtype=jnp.float32
    ) * (1.0 / (kernel_size * kernel_size)) ** 0.5
    w_pw = jax.random.normal(
        k_pw, (out_channels, in_channels, 1, 1), dtype=jnp.float32
    ) * (1.0 / in_channels) ** 0.5

    out = separable_conv2d(x, w_dw, w_pw, padding, padding_mode)
    out = jax.block_until_ready(out)

    ref = _reference(x, w_dw, w_pw, padding, padding_mode)
    assert out.shape == ref.shape == (N, out_channels, H, W)
    assert jnp.allclose(out, ref, atol=1e-4, rtol=1e-4), "mismatch vs reference conv"

    print("KERNEL_OK")
</pallas_src>

<mosaic_0001>
module attributes {stable_mosaic.version = 11 : i64} {
  func.func @_sepconv_kernel(%arg0: i32, %arg1: i32, %arg2: memref<1x4x16x16xf32, #tpu.memory_space<vmem>>, %arg3: memref<9x4xf32, #tpu.memory_space<vmem>>, %arg4: memref<8x4xf32, #tpu.memory_space<vmem>>, %arg5: memref<1x8x128xf32, #tpu.memory_space<vmem>>, %arg6: memref<4x18x18xf32, #tpu.memory_space<vmem>>) attributes {dimension_semantics = [#tpu.dimension_semantics<parallel>, #tpu.dimension_semantics<parallel>], iteration_bounds = array<i64: 2, 2>, scalar_prefetch = 0 : i64, scratch_operands = 1 : i64, tpu.core_type = #tpu.core_type<tc>, window_params = [{transform_indices = @transform_0, window_bounds = array<i64: 1, 4, 16, 16>}, {pipeline_mode = #tpu.pipeline_mode<synchronous>, transform_indices = @transform_1, window_bounds = array<i64: 9, 4>}, {pipeline_mode = #tpu.pipeline_mode<synchronous>, transform_indices = @transform_2, window_bounds = array<i64: 8, 4>}, {transform_indices = @transform_3, window_bounds = array<i64: 1, 8, 128>}]} {
    %c8_i32 = arith.constant 8 : i32
    %0 = arith.muli %arg1, %c8_i32 : i32
    %1 = tpu.assume_multiple %0, 8 : i32
    %cst = arith.constant 0.000000e+00 : f32
    %2 = vector.broadcast %cst : f32 to vector<4x18x18xf32>
    %c0 = arith.constant 0 : index
    %c0_0 = arith.constant 0 : index
    %c0_1 = arith.constant 0 : index
    %3 = vector.load %arg6[%c0, %c0_0, %c0_1] : memref<4x18x18xf32, #tpu.memory_space<vmem>>, vector<4x18x18xf32>
    tpu.vector_store %arg6[%c0, %c0_0, %c0_1], %2 {strides = array<i32>} : memref<4x18x18xf32, #tpu.memory_space<vmem>>, vector<4x18x18xf32>,
    %c0_2 = arith.constant 0 : index
    %c0_3 = arith.constant 0 : index
    %c0_4 = arith.constant 0 : index
    %c0_5 = arith.constant 0 : index
    %4 = vector.load %arg2[%c0_2, %c0_3, %c0_4, %c0_5] : memref<1x4x16x16xf32, #tpu.memory_space<vmem>>, vector<1x4x16x16xf32>
    %5 = vector.shape_cast %4 : vector<1x4x16x16xf32> to vector<4x16x16xf32>
    %c0_6 = arith.constant 0 : index
    %c1 = arith.constant 1 : index
    %c1_7 = arith.constant 1 : index
    %6 = vector.load %arg6[%c0_6, %c1, %c1_7] : memref<4x18x18xf32, #tpu.memory_space<vmem>>, vector<4x16x16xf32>
    tpu.vector_store %arg6[%c0_6, %c1, %c1_7], %5 {strides = array<i32>} : memref<4x18x18xf32, #tpu.memory_space<vmem>>, vector<4x16x16xf32>,
    %cst_8 = arith.constant 0.000000e+00 : f32
    %7 = vector.broadcast %cst_8 : f32 to vector<4x8x16xf32>
    %c0_9 = arith.constant 0 : index
    %c0_10 = arith.constant 0 : index
    %8 = vector.load %arg3[%c0_9, %c0_10] : memref<9x4xf32, #tpu.memory_space<vmem>>, vector<1x4xf32>
    %9 = vector.shape_cast %8 : vector<1x4xf32> to vector<4xf32>
    %c0_i32 = arith.constant 0 : i32
    %10 = arith.addi %1, %c0_i32 : i32
    %c0_11 = arith.constant 0 : index
    %11 = arith.index_cast %10 : i32 to index
    %c0_12 = arith.constant 0 : index
    %12 = vector.load %arg6[%c0_11, %11, %c0_12] : memref<4x18x18xf32, #tpu.memory_space<vmem>>, vector<4x8x16xf32>
    %13 = vector.shape_cast %9 : vector<4xf32> to vector<4x1x1xf32>
    %14 = vector.broadcast %13 : vector<4x1x1xf32> to vector<4x8x16xf32>
    %15 = arith.mulf %12, %14 : vector<4x8x16xf32>
    %16 = arith.addf %7, %15 : vector<4x8x16xf32>
    %c1_13 = arith.constant 1 : index
    %c0_14 = arith.constant 0 : index
    %17 = vector.load %arg3[%c1_13, %c0_14] : memref<9x4xf32, #tpu.memory_space<vmem>>, vector<1x4xf32>
    %18 = vector.shape_cast %17 : vector<1x4xf32> to vector<4xf32>
    %c0_i32_15 = arith.constant 0 : i32
    %19 = arith.addi %1, %c0_i32_15 : i32
    %c0_16 = arith.constant 0 : index
    %20 = arith.index_cast %19 : i32 to index
    %c1_17 = arith.constant 1 : index
    %21 = vector.load %arg6[%c0_16, %20, %c1_17] : memref<4x18x18xf32, #tpu.memory_space<vmem>>, vector<4x8x16xf32>
    %22 = vector.shape_cast %18 : vector<4xf32> to vector<4x1x1xf32>
    %23 = vector.broadcast %22 : vector<4x1x1xf32> to vector<4x8x16xf32>
    %24 = arith.mulf %21, %23 : vector<4x8x16xf32>
    %25 = arith.addf %16, %24 : vector<4x8x16xf32>
    %c2 = arith.constant 2 : index
    %c0_18 = arith.constant 0 : index
    %26 = vector.load %arg3[%c2, %c0_18] : memref<9x4xf32, #tpu.memory_space<vmem>>, vector<1x4xf32>
    %27 = vector.shape_cast %26 : vector<1x4xf32> to vector<4xf32>
    %c0_i32_19 = arith.constant 0 : i32
    %28 = arith.addi %1, %c0_i32_19 : i32
    %c0_20 = arith.constant 0 : index
    %29 = arith.index_cast %28 : i32 to index
    %c2_21 = arith.constant 2 : index
    %30 = vector.load %arg6[%c0_20, %29, %c2_21] : memref<4x18x18xf32, #tpu.memory_space<vmem>>, vector<4x8x16xf32>
    %31 = vector.shape_cast %27 : vector<4xf32> to vector<4x1x1xf32>
    %32 = vector.broadcast %31 : vector<4x1x1xf32> to vector<4x8x16xf32>
    %33 = arith.mulf %30, %32 : vector<4x8x16xf32>
    %34 = arith.addf %25, %33 : vector<4x8x16xf32>
    %c3 = arith.constant 3 : index
    %c0_22 = arith.constant 0 : index
    %35 = vector.load %arg3[%c3, %c0_22] : memref<9x4xf32, #tpu.memory_space<vmem>>, vector<1x4xf32>
    %36 = vector.shape_cast %35 : vector<1x4xf32> to vector<4xf32>
    %c1_i32 = arith.constant 1 : i32
    %37 = arith.addi %1, %c1_i32 : i32
    %c0_23 = arith.constant 0 : index
    %38 = arith.index_cast %37 : i32 to index
    %c0_24 = arith.constant 0 : index
    %39 = vector.load %arg6[%c0_23, %38, %c0_24] : memref<4x18x18xf32, #tpu.memory_space<vmem>>, vector<4x8x16xf32>
    %40 = vector.shape_cast %36 : vector<4xf32> to vector<4x1x1xf32>
    %41 = vector.broadcast %40 : vector<4x1x1xf32> to vector<4x8x16xf32>
    %42 = arith.mulf %39, %41 : vector<4x8x16xf32>
    %43 = arith.addf %34, %42 : vector<4x8x16xf32>
    %c4 = arith.constant 4 : index
    %c0_25 = arith.constant 0 : index
    %44 = vector.load %arg3[%c4, %c0_25] : memref<9x4xf32, #tpu.memory_space<vmem>>, vector<1x4xf32>
    %45 = vector.shape_cast %44 : vector<1x4xf32> to vector<4xf32>
    %c1_i32_26 = arith.constant 1 : i32
    %46 = arith.addi %1, %c1_i32_26 : i32
    %c0_27 = arith.constant 0 : index
    %47 = arith.index_cast %46 : i32 to index
    %c1_28 = arith.constant 1 : index
    %48 = vector.load %arg6[%c0_27, %47, %c1_28] : memref<4x18x18xf32, #tpu.memory_space<vmem>>, vector<4x8x16xf32>
    %49 = vector.shape_cast %45 : vector<4xf32> to vector<4x1x1xf32>
    %50 = vector.broadcast %49 : vector<4x1x1xf32> to vector<4x8x16xf32>
    %51 = arith.mulf %48, %50 : vector<4x8x16xf32>
    %52 = arith.addf %43, %51 : vector<4x8x16xf32>
    %c5 = arith.constant 5 : index
    %c0_29 = arith.constant 0 : index
    %53 = vector.load %arg3[%c5, %c0_29] : memref<9x4xf32, #tpu.memory_space<vmem>>, vector<1x4xf32>
    %54 = vector.shape_cast %53 : vector<1x4xf32> to vector<4xf32>
    %c1_i32_30 = arith.constant 1 : i32
    %55 = arith.addi %1, %c1_i32_30 : i32
    %c0_31 = arith.constant 0 : index
    %56 = arith.index_cast %55 : i32 to index
    %c2_32 = arith.constant 2 : index
    %57 = vector.load %arg6[%c0_31, %56, %c2_32] : memref<4x18x18xf32, #tpu.memory_space<vmem>>, vector<4x8x16xf32>
    %58 = vector.shape_cast %54 : vector<4xf32> to vector<4x1x1xf32>
    %59 = vector.broadcast %58 : vector<4x1x1xf32> to vector<4x8x16xf32>
    %60 = arith.mulf %57, %59 : vector<4x8x16xf32>
    %61 = arith.addf %52, %60 : vector<4x8x16xf32>
    %c6 = arith.constant 6 : index
    %c0_33 = arith.constant 0 : index
    %62 = vector.load %arg3[%c6, %c0_33] : memref<9x4xf32, #tpu.memory_space<vmem>>, vector<1x4xf32>
    %63 = vector.shape_cast %62 : vector<1x4xf32> to vector<4xf32>
    %c2_i32 = arith.constant 2 : i32
    %64 = arith.addi %1, %c2_i32 : i32
    %c0_34 = arith.constant 0 : index
    %65 = arith.index_cast %64 : i32 to index
    %c0_35 = arith.constant 0 : index
    %66 = vector.load %arg6[%c0_34, %65, %c0_35] : memref<4x18x18xf32, #tpu.memory_space<vmem>>, vector<4x8x16xf32>
    %67 = vector.shape_cast %63 : vector<4xf32> to vector<4x1x1xf32>
    %68 = vector.broadcast %67 : vector<4x1x1xf32> to vector<4x8x16xf32>
    %69 = arith.mulf %66, %68 : vector<4x8x16xf32>
    %70 = arith.addf %61, %69 : vector<4x8x16xf32>
    %c7 = arith.constant 7 : index
    %c0_36 = arith.constant 0 : index
    %71 = vector.load %arg3[%c7, %c0_36] : memref<9x4xf32, #tpu.memory_space<vmem>>, vector<1x4xf32>
    %72 = vector.shape_cast %71 : vector<1x4xf32> to vector<4xf32>
    %c2_i32_37 = arith.constant 2 : i32
    %73 = arith.addi %1, %c2_i32_37 : i32
    %c0_38 = arith.constant 0 : index
    %74 = arith.index_cast %73 : i32 to index
    %c1_39 = arith.constant 1 : index
    %75 = vector.load %arg6[%c0_38, %74, %c1_39] : memref<4x18x18xf32, #tpu.memory_space<vmem>>, vector<4x8x16xf32>
    %76 = vector.shape_cast %72 : vector<4xf32> to vector<4x1x1xf32>
    %77 = vector.broadcast %76 : vector<4x1x1xf32> to vector<4x8x16xf32>
    %78 = arith.mulf %75, %77 : vector<4x8x16xf32>
    %79 = arith.addf %70, %78 : vector<4x8x16xf32>
    %c8 = arith.constant 8 : index
    %c0_40 = arith.constant 0 : index
    %80 = vector.load %arg3[%c8, %c0_40] : memref<9x4xf32, #tpu.memory_space<vmem>>, vector<1x4xf32>
    %81 = vector.shape_cast %80 : vector<1x4xf32> to vector<4xf32>
    %c2_i32_41 = arith.constant 2 : i32
    %82 = arith.addi %1, %c2_i32_41 : i32
    %c0_42 = arith.constant 0 : index
    %83 = arith.index_cast %82 : i32 to index
    %c2_43 = arith.constant 2 : index
    %84 = vector.load %arg6[%c0_42, %83, %c2_43] : memref<4x18x18xf32, #tpu.memory_space<vmem>>, vector<4x8x16xf32>
    %85 = vector.shape_cast %81 : vector<4xf32> to vector<4x1x1xf32>
    %86 = vector.broadcast %85 : vector<4x1x1xf32> to vector<4x8x16xf32>
    %87 = arith.mulf %84, %86 : vector<4x8x16xf32>
    %88 = arith.addf %79, %87 : vector<4x8x16xf32>
    %89 = vector.shape_cast %88 : vector<4x8x16xf32> to vector<4x128xf32>
    %c0_44 = arith.constant 0 : index
    %c0_45 = arith.constant 0 : index
    %90 = vector.load %arg4[%c0_44, %c0_45] : memref<8x4xf32, #tpu.memory_space<vmem>>, vector<8x4xf32>
    %cst_46 = arith.constant dense<0.000000e+00> : vector<8x128xf32>
    %91 = tpu.matmul %90, %89, %cst_46 {dimension_numbers = #tpu.dot_dimension_numbers<[1], [0], [0], [1], [0, 0, 1, 1], [], []>} : vector<8x4xf32>, vector<4x128xf32>, vector<8x128xf32> -> vector<8x128xf32>
    %c0_47 = arith.constant 0 : index
    %c0_48 = arith.constant 0 : index
    %c0_49 = arith.constant 0 : index
    %92 = vector.load %arg5[%c0_47, %c0_48, %c0_49] : memref<1x8x128xf32, #tpu.memory_space<vmem>>, vector<1x8x128xf32>
    %93 = vector.shape_cast %92 : vector<1x8x128xf32> to vector<8x128xf32>
    %94 = vector.shape_cast %91 : vector<8x128xf32> to vector<1x8x128xf32>
    tpu.vector_store %arg5[%c0_47, %c0_48, %c0_49], %94 {strides = array<i32>} : memref<1x8x128xf32, #tpu.memory_space<vmem>>, vector<1x8x128xf32>,
    return
  }
  func.func @transform_0(%arg0: i32, %arg1: i32) -> (i32, i32, i32, i32) {
    %c0_i32 = arith.constant 0 : i32
    %c0_i32_0 = arith.constant 0 : i32
    %c0_i32_1 = arith.constant 0 : i32
    %c0_i32_2 = arith.constant 0 : i32
    return %arg0, %c0_i32, %c0_i32_0, %c0_i32_1 : i32, i32, i32, i32
  }
  func.func @transform_1(%arg0: i32, %arg1: i32) -> (i32, i32) {
    %c0_i32 = arith.constant 0 : i32
    %c0_i32_0 = arith.constant 0 : i32
    %c0_i32_1 = arith.constant 0 : i32
    return %c0_i32, %c0_i32_0 : i32, i32
  }
  func.func @transform_2(%arg0: i32, %arg1: i32) -> (i32, i32) {
    %c0_i32 = arith.constant 0 : i32
    %c0_i32_0 = arith.constant 0 : i32
    %c0_i32_1 = arith.constant 0 : i32
    return %c0_i32, %c0_i32_0 : i32, i32
  }
  func.func @transform_3(%arg0: i32, %arg1: i32) -> (i32, i32, i32) {
    %c0_i32 = arith.constant 0 : i32
    %c0_i32_0 = arith.constant 0 : i32
    return %arg0, %c0_i32, %arg1 : i32, i32, i32
  }
}

</mosaic_0001>

<bundles_post_ra>
// kernel: tpu_custom_call.1
= control target key start
LH: loop header
LB: loop body
LE: loop exit
PB: predicated region body
PF: predicated region fallthrough
CT: control target
= control target key end

     0   :  { %8 = vsyncpa [#allocation4], 0  ;;  %s1753_s0 = inlined_call_operand.hbm [shape: f32[2,4,16,16], index: 0, kind: input, shape index: {}]   ;;  %s1754_s1 = inlined_call_operand.vmem [shape: f32[9,4], index: 1, kind: input, shape index: {}]   ;;  %s1755_s2 = inlined_call_operand.vmem [shape: f32[8,4], index: 2, kind: input, shape index: {}]   ;;  %s1756_s3 = inlined_call_operand.hbm [shape: f32[2,8,256], index: 3, kind: output, shape index: {}]  }
   0x1   :  { %10 = vsyncpa [#allocation4 + $0x1], 0 }
   0x2   :  { %11 = vsyncpa [#allocation5], 0 }
   0x3   :  { %13 = vsyncpa [#allocation5 + $0x1], 0  ;;  %s1320_s12 = smov 0   ;;  %s1322_s13 = smov 0  }
   0x4   :  { %s1324_s14 = smov 0   ;;  %s1326_s15 = smov 0  }
   0x5   :  { %s1328_s16 = smov 0   ;;  %s1330_s17 = smov 0  }
   0x6   :  { %s1332_s18 = smov 0   ;;  %s1334_s19 = smov 0  }
   0x7   :  { %s1336_s20 = smov 0   ;;  %s1338_s21 = smov 0  }
   0x8   :  { %s1340_s22 = smov 0  }
   0x9 LB: > { %s965_s23 = sadd.s32 4294967295, %s1280_s22   ;;  %s966_s24 = sadd.s32 4294967294, %s1280_s22   ;;  %s1280_s22 = sphi %s1340_s22, %s19_s22   ;;  %s1276_s21 = sphi %s1338_s21, %s1778_s21   ;;  %s1272_s20 = sphi %s1336_s20, %s1777_s20   ;;  %s1268_s19 = sphi %s1334_s19, %s1776_s19   ;;  %s1264_s18 = sphi %s1332_s18, %s1775_s18   ;;  %s1260_s17 = sphi %s1330_s17, %s1774_s17   ;;  %s1256_s16 = sphi %s1328_s16, %s1773_s16   ;;  %s1252_s15 = sphi %s1326_s15, %s1772_s15   ;;  %s1248_s14 = sphi %s1324_s14, %s1771_s14   ;;  %s1244_s13 = sphi %s1322_s13, %s1770_s13   ;;  %s1240_s12 = sphi %s1320_s12, %s1769_s12  }
   0xa   : > { %s28_s25 = sadd.s32 1, %s1272_s20  ;;  %s31_s26 = sadd.s32 1, %s1276_s21 }
   0xb   : > { %p29_p0 = scmp.ge.s32.totalorder %s28_s25, 2  ;;  %s38_s27 = sadd.s32 1, %s1260_s17 }
   0xc   : > { %p45_p1 = scmp.ne.s32.totalorder %s1260_s17, %s1256_s16  ;;  %p46_p2 = scmp.eq.s32.totalorder %s1280_s22, 0 }
   0xd   : > { %s1780_s25 = smov (%p29_p0, %s28_s25), 0  ;;  %s1782_s26 = smov (!%p29_p0, %s31_s26), %s1276_s21 }
   0xe   : > { %p1384_p3 = por %p46_p2, %p45_p1  ;;  %p51_p4 = scmp.ne.s32.totalorder %s1256_s16, %s1252_s15 }
   0xf   : > { %p33_p5 = scmp.ge.s32.totalorder %s1782_s26, 2  ;;  %p52_p6 = scmp.eq.s32.totalorder %s965_s23, 0 }
  0x10   : > { %s104_s29 = ssub.s32 %s1272_s20, %s1780_s25  ;;  %s108_s30 = sadd.s32 1, %s1248_s14 }
  0x11   : > { %s1784_s26 = smov (%p33_p5, %s1782_s26), 0  ;;  %p1394_p7 = por %p52_p6, %p51_p4 }
  0x12   : > { %1760 = sst [smem:[#allocation9_spill]] %s1784_s26  ;;  %p118_p8 = scmp.ne.s32.totalorder %s1248_s14, %s1244_s13 }
  0x13   : > { %s35_s5 = ssub.s32 %s1276_s21, %s1784_s26  ;;  %p119_p9 = scmp.eq.s32.totalorder %s965_s23, 3 }
  0x14   : > { %p36_p10 = scmp.eq.s32.totalorder %s35_s5, 0  ;;  %s105_s6 = sor.u32 %s104_s29, %s35_s5 }
  0x15   : > { %p106_p11 = scmp.eq.s32.totalorder %s105_s6, 0  ;;  %p1402_p12 = por %p119_p9, %p118_p8 }
  0x16   : > { %s1407_s8 = scalar_select %p36_p10, %s1260_s17, %s38_s27  }
  0x17   : > { %s1762_s7 = scalar_select %p1402_p12, 1, 0 }
  0x18   : > { %s1410_s9 = scalar_select %p106_p11, %s1248_s14, %s108_s30  }
  0x19   : > { %p124_p13 = scmp.ne.s32.totalorder %s1244_s13, %s1240_s12  ;;  %p125_p0 = scmp.eq.s32.totalorder %s966_s24, 3 }
  0x1a   : > { %p1022_p1 = scmp.lt.s32.totalorder %s1280_s22, 4  ;;  %s151_s11 = sand.u32 1, %s1260_s17  }
  0x1b   : > { %p1415_p2 = por %p125_p0, %p124_p13  ;;  %s969_s15 = sshll.u32 %s151_s11, 6 }
  0x1c   : > { %s1002_s23 = sshll.u32 %s1276_s21, 10  ;;  %s155_s27 = scalar_lea.vmem [#allocation3], %s969_s15 }
  0x1d   : > { %s1763_s10 = scalar_select %p1415_p2, 1, 0 }
  0x1e   : > { %s1424_s6 = scalar_lea.hbm %s1753_s0, %s1002_s23  ;;  %s162_s30 = sshll.u32 %s155_s27, 4  ;;  %s1426_s30 = int_to_ptr.vmem [resolvable:$true] %s162_s30 }
  0x1f   : > { %p1430_p4 = pnand %p1022_p1, %p1384_p3  ;;  %s1435_s26 = scalar_lea.sflag [#allocation4], %s151_s11 }
  0x20   : > { %s1128_s23 = scalar_lea.hbm %s1424_s6, 1024  ;;  %s1133_s28 = scalar_lea.hbm %s1753_s0, 2048 }
  0x21   : > { %p1129_p6 = scmp.ne.s32.totalorder %s1424_s6, %s1128_s23  ;;  %p1130_p8 = pneg %p1430_p4 }
  0x22   : > { %p1134_p3 = scmp.lt.u32.totalorder %s1424_s6, %s1753_s0  ;;  %p1135_p11 = scmp.lt.u32.totalorder %s1133_s28, %s1128_s23 }
  0x23   : > { %p1131_p9 = pnand %p1130_p8, %p1129_p6  ;;  %p1137_p0 = scmp.lt.u32.totalorder %s1128_s23, %s1424_s6 }
  0x24   : > { %p1136_p13 = por %p1135_p11, %p1134_p3 }
  0x25   : > { %p1132_p10 = pneg %p1131_p9 }
  0x26   : > { %p1138_p1 = por %p1137_p0, %p1136_p13 }
  0x28   : > { %p1139_p5 = pnand %p1138_p1, %p1132_p10 }
  0x2a   : > { %1142 = shalt.err (!%p1139_p5)
}
  0x2b   : > { %s1143_s11 = scalar_lea.vmem %s1426_s30, 1024  ;;  %s1282_s15 = smov [#allocation3]  }
  0x2c   : > { %p1144_p6 = scmp.ne.s32.totalorder %s1426_s30, %s1143_s11  ;;  %s1148_s29 = sshll.u32 %s1282_s15, 4  ;;  %s1149_s29 = int_to_ptr.vmem [resolvable:$false] %s1148_s29 }
  0x2d   : > { %s1150_s5 = scalar_lea.vmem %s1149_s29, 2048  ;;  %p1151_p12 = scmp.lt.s32.totalorder %s1426_s30, %s1149_s29 }
  0x2e   : > { %p1146_p9 = pnand %p1144_p6, %p1130_p8  ;;  %p1152_p3 = scmp.lt.s32.totalorder %s1150_s5, %s1143_s11 }
  0x30   : > { %p1147_p2 = pneg %p1146_p9  ;;  %p1153_p11 = por %p1152_p3, %p1151_p12 }
  0x32   : > { %p1154_p13 = pnand %p1153_p11, %p1147_p2 }
  0x34   : > { %1157 = shalt.err (!%p1154_p13)
}
  0x35   : > { %s1283_s23 = smov 128   ;;  %s1284_s28 = smov 8  }
  0x36   : > { %1017 = dma.hbm_to_vmem [thread:$0]  (!%p1430_p4), %s1424_s6, 1024, %s1426_s30, %s1435_s26, %s1283_s23, %s1283_s23, %s1284_s28  }
  0x37   : > { %p170_p5 = scmp.lt.s32.totalorder %s1280_s22, 5  ;;  %p1765_p8 = scmp.ge.s32.totalorder %s1280_s22, 1 }
  0x39   : > { %p171_p10 = pnand %p1765_p8, %p170_p5 }
  0x3a   : > { %s176_s27 = sand.u32 (!%p171_p10), 1, %s1256_s16  }
  0x3b   : > { %174 = sbr.rel (%p171_p10) target bundleno = 732 (0x2dc), region = 32  ;;  %s973_s11 = sshll.u32 (!%p171_p10), %s176_s27, 6 }
  0x3c   : > { %s177_s15 = scalar_lea.sflag (!%p171_p10), [#allocation4], %s176_s27  ;;  %s1467_s29 = scalar_lea.vmem (!%p171_p10), [#allocation3], %s973_s11 }
  0x42   : > { %1231 = dma.done.wait (%p1394_p7), %s177_s15, 1024  }
  0x43   : > { %1233 = vsyncadd (%p1394_p7), %s177_s15, 4294966272  ;;  %vm204_vm0 = vcmask 146432   ;;  %vm207_vm1 = vcmask 140288   ;;  %v1285_v0 = vmov 0.0   ;;  %v220_v1 = vld [vmem:[%s1467_s29 + $0x10] sm:$0xff]  ;;  %v218_v2 = vld [vmem:[%s1467_s29] sm:$0xff]  ;;  %v280_v22 = vlaneseq }
  0x44   : > { %205 = vst.msk [vmem:[#allocation2] sm:$0xff] %vm204_vm0, %v1285_v0  ;;  %209 = vst.msk [vmem:[#allocation2 + $0x18] sm:$0xff] %vm204_vm0, %v1285_v0  ;;  %1005 = vmatprep.subr.mxu0 %v1285_v0  ;;  %s1286_s26 = smov 1   ;;  %v221_v3 = vld [vmem:[%s1467_s29 + $0x18] sm:$0xff]  ;;  %v219_v4 = vld [vmem:[%s1467_s29 + $0x8] sm:$0xff]  ;;  %vm258_vm2 = vcmask 138248  }
  0x45   : > { %210 = vst.msk [vmem:[#allocation2 + $0x20] sm:$0xff] %vm204_vm0, %v1285_v0  ;;  %212 = vst.msk [vmem:[#allocation2 + $0x30] sm:$0xff] %vm204_vm0, %v1285_v0  ;;  %238 = vrot.lane.b32.xlu1 %v220_v1, %s1286_s26  ;;  %234 = vrot.lane.b32.xlu0 %v218_v2, %s1286_s26  ;;  %v223_v5 = vld [vmem:[%s1467_s29 + $0x28] sm:$0xff]  ;;  %v222_v6 = vld [vmem:[%s1467_s29 + $0x20] sm:$0xff]  ;;  %v1527_v25 = vshrl.u32 %v280_v22, 7  ;;  %s975_s28 = sshll.u32 %s1264_s18, 3 }
  0x46   : > { %215 = vst.msk [vmem:[#allocation2 + $0x48] sm:$0xff] %vm204_vm0, %v1285_v0  ;;  %206 = vst.msk [vmem:[#allocation2 + $0x8] sm:$0xff] %vm204_vm0, %v1285_v0  ;;  %v225_v7 = vld [vmem:[%s1467_s29 + $0x38] sm:$0xff]  ;;  %v224_v8 = vld [vmem:[%s1467_s29 + $0x30] sm:$0xff]  ;;  %s1550_s27 = scalar_lea.vmem [#allocation2], %s975_s28  ;;  %s1287_s11 = smov 127  }
  0x47   : > { %213 = vst.msk [vmem:[#allocation2 + $0x38] sm:$0xff] %vm204_vm0, %v1285_v0  ;;  %216 = vst.msk [vmem:[#allocation2 + $0x50] sm:$0xff] %vm204_vm0, %v1285_v0  ;;  %v978_v9 = vld [vmem:[%s1754_s1 + $0x2] ss:$0 sm:$0xff]  ;;  %v977_v10 = vld [vmem:[%s1754_s1 + $0x1] ss:$0 sm:$0xff] }
  0x48   : > { %211 = vst.msk [vmem:[#allocation2 + $0x28] sm:$0x3] %vm207_vm1, %v1285_v0  ;;  %208 = vst.msk [vmem:[#allocation2 + $0x10] sm:$0x3] %vm207_vm1, %v1285_v0  ;;  %v986_v11 = vld [vmem:[%s1754_s1 + $0x5] ss:$0 sm:$0xff] }
  0x49   : > { %214 = vst.msk [vmem:[#allocation2 + $0x40] sm:$0x3] %vm207_vm1, %v1285_v0  ;;  %217 = vst.msk [vmem:[#allocation2 + $0x58] sm:$0x3] %vm207_vm1, %v1285_v0  ;;  %240 = vrot.lane.b32.xlu1 %v221_v3, %s1286_s26  ;;  %236 = vrot.lane.b32.xlu0 %v219_v4, %s1286_s26  ;;  %v985_v12 = vld [vmem:[%s1754_s1 + $0x4] ss:$0 sm:$0xff] }
  0x4a   : > { %v994_v13 = vld [vmem:[%s1754_s1 + $0x8] ss:$0 sm:$0xff]  ;;  %v993_v14 = vld [vmem:[%s1754_s1 + $0x7] ss:$0 sm:$0xff]  ;;  %v984_v15 = vld [vmem:[%s1754_s1 + $0x3] ss:$0 sm:$0xff] }
  0x4b   : > { %v976_v16 = vld [vmem:[%s1754_s1] ss:$0 sm:$0xff]  ;;  %v992_v17 = vld [vmem:[%s1754_s1 + $0x6] ss:$0 sm:$0xff]  ;;  %v1533_v28 = vsub.s32 0, %v1527_v25  ;;  %v1536_v29 = vsub.s32 1, %v1527_v25 }
  0x4c   : > { %v1539_v32 = vsub.s32 2, %v1527_v25  ;;  %v1542_v33 = vsub.s32 3, %v1527_v25  ;;  %s1288_s15 = smov 126   ;;  %s1291_s29 = smov 32   ;;  %vm1293_vm3 = vmmov 0   ;;  %vm764_vm4 = vcmask 130048  }
  0x4d   : > { %244 = vrot.lane.b32.xlu1 %v223_v5, %s1286_s26  ;;  %242 = vrot.lane.b32.xlu0 %v222_v6, %s1286_s26  ;;  %s1294_s4 = smov 64   ;;  %s1295_s6 = smov 48   ;;  %vm766_vm5 = vcmask 261120   ;;  %vm768_vm6 = vcmask 392192   ;;  %vm770_vm7 = vcmask 523264   ;;  %vm772_vm8 = vcmask 654336  }
  0x4e   : > { %1007 = vmatprep.mubr.msk.f32.mxu0 %vm1293_vm3, %v1285_v0  ;;  %s1296_s30 = smov 96   ;;  %s1297_s24 = smov 80   ;;  %vm774_vm9 = vcmask 785408   ;;  %vm776_vm10 = vcmask 916480   ;;  %vm783_vm11 = vcmask 1043456   ;;  %vm779_vm12 = vcmask 31744  }
  0x4f   : > { %s1298_s5 = smov 112   ;;  %p1766_p12 = scmp.ne.s32.totalorder %s1762_s7, 0 }
  0x51   : > { %248 = vrot.lane.b32.xlu1 %v225_v7, %s1286_s26  ;;  %246 = vrot.lane.b32.xlu0 %v224_v8, %s1286_s26  ;;  %s1292_s26 = smov 16  }
  0x55   : > { %358 = vbcast.lane.b32.xlu1 %v978_v9, 256  ;;  %310 = vbcast.lane.b32.xlu0 %v977_v10, 256 }
  0x59   : > { %492 = vbcast.lane.b32.xlu1 %v986_v11, 256  ;;  %444 = vbcast.lane.b32.xlu0 %v985_v12, 256 }
  0x5d   : > { %626 = vbcast.lane.b32.xlu1 %v994_v13, 256  ;;  %578 = vbcast.lane.b32.xlu0 %v993_v14, 256 }
  0x61   : > { %412 = vbcast.lane.b32.xlu1 %v984_v15, 256  ;;  %278 = vbcast.lane.b32.xlu0 %v976_v16, 256 }
  0x65   : > { %546 = vbcast.lane.b32.xlu0 %v992_v17, 256 }
  0xb7   : > { %v239_v18 = vpop.permute.xlu1 %238  ;;  %v235_v19 = vpop.permute.xlu0 %234 }
  0xb8   : > { %261 = vst.msk [vmem:[#allocation2 + $0x19] sm:$0xff] %vm258_vm2, %v239_v18  ;;  %259 = vst.msk [vmem:[#allocation2 + $0x1] sm:$0xff] %vm258_vm2, %v235_v19 }
  0xbb   : > { %v241_v20 = vpop.permute.xlu1 %240  ;;  %v237_v21 = vpop.permute.xlu0 %236 }
  0xbc   : > { %262 = vst.msk [vmem:[#allocation2 + $0x21] sm:$0xff] %vm258_vm2, %v241_v20  ;;  %260 = vst.msk [vmem:[#allocation2 + $0x9] sm:$0xff] %vm258_vm2, %v237_v21 }
  0xbf   : > { %v245_v23 = vpop.permute.xlu1 %244  ;;  %v243_v24 = vpop.permute.xlu0 %242 }
  0xc0   : > { %264 = vst.msk [vmem:[#allocation2 + $0x39] sm:$0xff] %vm258_vm2, %v245_v23  ;;  %263 = vst.msk [vmem:[#allocation2 + $0x31] sm:$0xff] %vm258_vm2, %v243_v24 }
  0xc3   : > { %v249_v26 = vpop.permute.xlu1 %248  ;;  %v247_v27 = vpop.permute.xlu0 %246 }
  0xc4   : > { %266 = vst.msk [vmem:[#allocation2 + $0x51] sm:$0xff] %vm258_vm2, %v249_v26  ;;  %265 = vst.msk [vmem:[#allocation2 + $0x49] sm:$0xff] %vm258_vm2, %v247_v27 }
  0xc7   : > { %v359_v30 = vpop.permute.xlu1 %358  ;;  %v311_v31 = vpop.permute.xlu0 %310 }
  0xc8   : > { %v315_v34 = vrot.slane %v311_v31, %v1533_v28  ;;  %v319_v35 = vrot.slane %v311_v31, %v1536_v29  ;;  %v323_v40 = vrot.slane %v311_v31, %v1539_v32  ;;  %v327_v41 = vrot.slane %v311_v31, %v1542_v33 }
  0xc9   : > { %v363_v48 = vrot.slane %v359_v30, %v1533_v28  ;;  %v367_v49 = vrot.slane %v359_v30, %v1536_v29  ;;  %v371_v50 = vrot.slane %v359_v30, %v1539_v32  ;;  %v375_v53 = vrot.slane %v359_v30, %v1542_v33 }
  0xcb   : > { %v1546_v36 = vpop.permute.xlu1 %492  ;;  %v1548_v37 = vpop.permute.xlu0 %444  ;;  %v270_v38 = vld [vmem:[%s1550_s27 + $0x18] sm:$0xff]  ;;  %v269_v39 = vld [vmem:[%s1550_s27] sm:$0xff]  ;;  %v272_v46 = vld [vmem:[%s1550_s27 + $0x48] sm:$0xff] }
  0xcc   : > { %v329_v42 = vmul.f32 %v319_v35, %v270_v38  ;;  %v328_v43 = vmul.f32 %v315_v34, %v269_v39  ;;  %v271_v47 = vld [vmem:[%s1550_s27 + $0x30] sm:$0xff]  ;;  %v331_v51 = vmul.f32 %v327_v41, %v272_v46  ;;  %v449_v56 = vrot.slane %v1548_v37, %v1533_v28  ;;  %v980_v10 = vld [vmem:[%s1550_s27 + $0x1] sm:$0xff]  ;;  %v981_v11 = vld [vmem:[%s1550_s27 + $0x19] sm:$0xff] }
  0xcd   : > { %v330_v52 = vmul.f32 %v323_v40, %v271_v47  ;;  %v453_v57 = vrot.slane %v1548_v37, %v1536_v29  ;;  %v376_v58 = vmul.f32 %v363_v48, %v269_v39  ;;  %v377_v59 = vmul.f32 %v367_v49, %v270_v38  ;;  %v982_v12 = vld [vmem:[%s1550_s27 + $0x31] sm:$0xff]  ;;  %v983_v16 = vld [vmem:[%s1550_s27 + $0x49] sm:$0xff]  ;;  %v989_v17 = vld [vmem:[%s1550_s27 + $0x1a] sm:$0xff] }
  0xce   : > { %338 = vrot.lane.b32.xlu0 %v329_v42, %s1287_s11  ;;  %336 = vrot.lane.b32.xlu1 %v328_v43, %s1287_s11  ;;  %v378_v63 = vmul.f32 %v371_v50, %v271_v47  ;;  %v379_v3 = vmul.f32 %v375_v53, %v272_v46  ;;  %v988_v18 = vld [vmem:[%s1550_s27 + $0x2] sm:$0xff]  ;;  %v991_v23 = vld [vmem:[%s1550_s27 + $0x4a] sm:$0xff]  ;;  %v461_v40 = vrot.slane %v1548_v37, %v1542_v33 }
  0xcf   : > { %v1556_v44 = vpop.permute.xlu1 %626  ;;  %v1558_v45 = vpop.permute.xlu0 %578  ;;  %v990_v24 = vld [vmem:[%s1550_s27 + $0x32] sm:$0xff]  ;;  %v462_v41 = vmul.f32 %v980_v10, %v449_v56  ;;  %v463_v42 = vmul.f32 %v981_v11, %v453_v57  ;;  %v497_v43 = vrot.slane %v1546_v36, %v1533_v28  ;;  %v509_v49 = vrot.slane %v1546_v36, %v1542_v33  ;;  %s200_s27 = sand.u32 1, %s1244_s13  }
  0xd0   : > { %v465_v48 = vmul.f32 %v983_v16, %v461_v40  ;;  %v587_v53 = vrot.slane %v1558_v45, %v1536_v29  ;;  %v595_v56 = vrot.slane %v1558_v45, %v1542_v33  ;;  %s859_s23 = scalar_lea.sflag [#allocation5], %s200_s27 }
  0xd2   : > { %342 = vrot.lane.b32.xlu0 %v331_v51, %s1287_s11  ;;  %340 = vrot.lane.b32.xlu1 %v330_v52, %s1287_s11  ;;  %v510_v51 = vmul.f32 %v980_v10, %v497_v43  ;;  %v583_v52 = vrot.slane %v1558_v45, %v1533_v28  ;;  %v597_v57 = vmul.f32 %v989_v17, %v587_v53 }
  0xd3   : > { %v413_v54 = vpop.permute.xlu1 %412  ;;  %v279_v55 = vpop.permute.xlu0 %278 }
  0xd4   : > { %v417_v60 = vrot.slane %v413_v54, %v1533_v28  ;;  %v421_v61 = vrot.slane %v413_v54, %v1536_v29  ;;  %v425_v62 = vrot.slane %v413_v54, %v1539_v32  ;;  %v429_v1 = vrot.slane %v413_v54, %v1542_v33 }
  0xd5   : > { %v287_v4 = vrot.slane %v279_v55, %v1536_v29  ;;  %v283_v5 = vrot.slane %v279_v55, %v1533_v28  ;;  %v295_v15 = vrot.slane %v279_v55, %v1542_v33  ;;  %v291_v19 = vrot.slane %v279_v55, %v1539_v32 }
  0xd6   : > { %384 = vrot.lane.b32.xlu0 %v376_v58, %s1288_s15  ;;  %386 = vrot.lane.b32.xlu1 %v377_v59, %s1288_s15  ;;  %v1598_v20 = vmul.f32 %v980_v10, %v417_v60  ;;  %v1600_v21 = vmul.f32 %v981_v11, %v421_v61  ;;  %v1602_v22 = vmul.f32 %v982_v12, %v425_v62 }
  0xd7   : > { %v547_v2 = vpop.permute.xlu0 %546  ;;  %v1589_v13 = vmul.f32 %v287_v4, %v270_v38  ;;  %v1591_v14 = vmul.f32 %v283_v5, %v269_v39  ;;  %v1606_v26 = vmul.f32 %v295_v15, %v272_v46  ;;  %v1608_v27 = vmul.f32 %v983_v16, %v429_v1 }
  0xd8   : > { %v551_v6 = vrot.slane %v547_v2, %v1533_v28  ;;  %v555_v7 = vrot.slane %v547_v2, %v1536_v29  ;;  %v559_v8 = vrot.slane %v547_v2, %v1539_v32  ;;  %v563_v9 = vrot.slane %v547_v2, %v1542_v33 }
  0xd9   : > { %v298_v34 = vmul.f32 %v291_v19, %v271_v47  ;;  %v457_v39 = vrot.slane %v1548_v37, %v1539_v32  ;;  %v501_v46 = vrot.slane %v1546_v36, %v1536_v29  ;;  %v505_v37 = vrot.slane %v1546_v36, %v1539_v32 }
  0xda   : > { %v1610_v30 = vmul.f32 %v989_v17, %v555_v7  ;;  %v1612_v31 = vmul.f32 %v988_v18, %v551_v6  ;;  %388 = vrot.lane.b32.xlu0 %v378_v63, %s1288_s15  ;;  %390 = vrot.lane.b32.xlu1 %v379_v3, %s1288_s15  ;;  %v1616_v35 = vmul.f32 %v991_v23, %v563_v9 }
  0xdb   : > { %v1618_v38 = vmul.f32 %v990_v24, %v559_v8  ;;  %v464_v47 = vmul.f32 %v982_v12, %v457_v39  ;;  %v511_v50 = vmul.f32 %v981_v11, %v501_v46  ;;  %v513_v54 = vmul.f32 %v983_v16, %v509_v49 }
  0xdc   : > { %v512_v55 = vmul.f32 %v982_v12, %v505_v37  ;;  %v591_v36 = vrot.slane %v1558_v45, %v1539_v32  ;;  %v596_v58 = vmul.f32 %v988_v18, %v583_v52  ;;  %v631_v59 = vrot.slane %v1556_v44, %v1533_v28 }
  0xdd   : > { %v635_v60 = vrot.slane %v1556_v44, %v1536_v29  ;;  %v599_v61 = vmul.f32 %v991_v23, %v595_v56  ;;  %v639_v45 = vrot.slane %v1556_v44, %v1539_v32  ;;  %v643_v63 = vrot.slane %v1556_v44, %v1542_v33 }
  0xde   : > { %470 = vrot.lane.b32.xlu0 %v462_v41, %s1287_s11  ;;  %472 = vrot.lane.b32.xlu1 %v463_v42, %s1287_s11  ;;  %v598_v62 = vmul.f32 %v990_v24, %v591_v36  ;;  %v644_v2 = vmul.f32 %v988_v18, %v631_v59  ;;  %v1289_v36 = vmov 1983009808  }
  0xdf   : > { %v645_v1 = vmul.f32 %v989_v17, %v635_v60  ;;  %v647_v28 = vmul.f32 %v991_v23, %v643_v63  ;;  %v646_v29 = vmul.f32 %v990_v24, %v639_v45  ;;  %v671_v56 = vunpack.c.l.s4 %v1289_v36 }
  0xe1   : > { %v672_v59 = vunpack.c.0.s8 %v671_v56 }
  0xe2   : > { %474 = vrot.lane.b32.xlu0 %v464_v47, %s1287_s11  ;;  %476 = vrot.lane.b32.xlu1 %v465_v48, %s1287_s11 }
  0xe3   : > { %v675_v63 = vsub.s32 %v672_v59, %v1527_v25 }
  0xe6   : > { %520 = vrot.lane.b32.xlu0 %v511_v50, %s1288_s15  ;;  %518 = vrot.lane.b32.xlu1 %v510_v51, %s1288_s15 }
  0xea   : > { %524 = vrot.lane.b32.xlu0 %v513_v54, %s1288_s15  ;;  %522 = vrot.lane.b32.xlu1 %v512_v55, %s1288_s15 }
  0xee   : > { %606 = vrot.lane.b32.xlu0 %v597_v57, %s1287_s11  ;;  %604 = vrot.lane.b32.xlu1 %v596_v58, %s1287_s11 }
  0xf2   : > { %610 = vrot.lane.b32.xlu0 %v599_v61, %s1287_s11  ;;  %608 = vrot.lane.b32.xlu1 %v598_v62, %s1287_s11  ;;  %s974_s11 = sshll.u32 %s200_s27, 3 }
  0xf6   : > { %654 = vrot.lane.b32.xlu0 %v645_v1, %s1288_s15  ;;  %652 = vrot.lane.b32.xlu1 %v644_v2, %s1288_s15 }
  0xfa   : > { %658 = vrot.lane.b32.xlu0 %v647_v28, %s1288_s15  ;;  %656 = vrot.lane.b32.xlu1 %v646_v29, %s1288_s15  ;;  %s998_s15 = sshll.u32 %s1268_s19, 1 }
 0x140   : > { %v339_v3 = vpop.permute.xlu0 %338  ;;  %v337_v4 = vpop.permute.xlu1 %336 }
 0x141   : > { %v349_v32 = vadd.f32 %v339_v3, %v1589_v13  ;;  %v348_v33 = vadd.f32 %v337_v4, %v1591_v14 }
 0x144   : > { %v343_v5 = vpop.permute.xlu0 %342  ;;  %v341_v6 = vpop.permute.xlu1 %340 }
 0x145   : > { %v351_v10 = vadd.f32 %v343_v5, %v1606_v26  ;;  %v350_v11 = vadd.f32 %v341_v6, %v298_v34 }
 0x148   : > { %v385_v44 = vpop.permute.xlu0 %384  ;;  %v387_v7 = vpop.permute.xlu1 %386 }
 0x149   : > { %v396_v8 = vadd.f32 %v385_v44, %v348_v33  ;;  %v397_v9 = vadd.f32 %v387_v7, %v349_v32 }
 0x14b   : > { %v434_v12 = vadd.f32 %v1598_v20, %v396_v8  ;;  %v435_v15 = vadd.f32 %v1600_v21, %v397_v9 }
 0x14c   : > { %v389_v16 = vpop.permute.xlu0 %388  ;;  %v391_v17 = vpop.permute.xlu1 %390 }
 0x14d   : > { %v398_v18 = vadd.f32 %v389_v16, %v350_v11  ;;  %v399_v19 = vadd.f32 %v391_v17, %v351_v10 }
 0x14f   : > { %v436_v23 = vadd.f32 %v1602_v22, %v398_v18  ;;  %v437_v13 = vadd.f32 %v1608_v27, %v399_v19 }
 0x150   : > { %v471_v14 = vpop.permute.xlu0 %470  ;;  %v473_v24 = vpop.permute.xlu1 %472 }
 0x151   : > { %v482_v41 = vadd.f32 %v471_v14, %v434_v12  ;;  %v483_v42 = vadd.f32 %v473_v24, %v435_v15 }
 0x154   : > { %v475_v39 = vpop.permute.xlu0 %474  ;;  %v477_v40 = vpop.permute.xlu1 %476 }
 0x155   : > { %v484_v46 = vadd.f32 %v475_v39, %v436_v23  ;;  %v485_v21 = vadd.f32 %v477_v40, %v437_v13 }
 0x158   : > { %v521_v26 = vpop.permute.xlu0 %520  ;;  %v519_v34 = vpop.permute.xlu1 %518 }
 0x159   : > { %v531_v43 = vadd.f32 %v521_v26, %v483_v42  ;;  %v530_v20 = vadd.f32 %v519_v34, %v482_v41 }
 0x15b   : > { %v569_v47 = vadd.f32 %v1610_v30, %v531_v43  ;;  %v568_v48 = vadd.f32 %v1612_v31, %v530_v20  ;;  %v1290_v30 = vmov 1934713408  }
 0x15c   : > { %v525_v37 = vpop.permute.xlu0 %524  ;;  %v523_v22 = vpop.permute.xlu1 %522  ;;  %v703_v60 = vunpack.c.l.s4 %v1290_v30 }
 0x15d   : > { %v533_v49 = vadd.f32 %v525_v37, %v485_v21  ;;  %v532_v27 = vadd.f32 %v523_v22, %v484_v46 }
 0x15f   : > { %v571_v50 = vadd.f32 %v1616_v35, %v533_v49  ;;  %v570_v51 = vadd.f32 %v1618_v38, %v532_v27  ;;  %v704_v38 = vunpack.c.0.s8 %v703_v60 }
 0x160   : > { %v607_v52 = vpop.permute.xlu0 %606  ;;  %v605_v53 = vpop.permute.xlu1 %604 }
 0x161   : > { %v617_v31 = vadd.f32 %v607_v52, %v569_v47  ;;  %v616_v61 = vadd.f32 %v605_v53, %v568_v48  ;;  %v707_v33 = vsub.s32 %v704_v38, %v1527_v25  ;;  %v778_v48 = vld [vmem:[%s1755_s2] sm:$0xff] }
 0x164   : > { %v611_v54 = vpop.permute.xlu0 %610  ;;  %v609_v55 = vpop.permute.xlu1 %608 }
 0x165   : > { %v619_v62 = vadd.f32 %v611_v54, %v571_v50  ;;  %v618_v45 = vadd.f32 %v609_v55, %v570_v51 }
 0x168   : > { %v655_v57 = vpop.permute.xlu0 %654  ;;  %v653_v58 = vpop.permute.xlu1 %652 }
 0x169   : > { %v665_v2 = vadd.f32 %v655_v57, %v617_v31  ;;  %v664_v28 = vadd.f32 %v653_v58, %v616_v61 }
 0x16c   : > { %v659_v35 = vpop.permute.xlu0 %658  ;;  %v657_v1 = vpop.permute.xlu1 %656 }
 0x16d   : > { %v667_v29 = vadd.f32 %v659_v35, %v619_v62  ;;  %v666_v3 = vadd.f32 %v657_v1, %v618_v45 }
 0x16f   : > { %v684_v4 = vcombine.low %v665_v2, %v667_v29  ;;  %v685_v5 = vcombine.high %v665_v2, %v667_v29  ;;  %v668_v6 = vcombine.low %v664_v28, %v666_v3  ;;  %v669_v32 = vcombine.high %v664_v28, %v666_v3 }
 0x171   : > { %v692_v44 = vrot.slane %v684_v4, %v675_v63  ;;  %v699_v7 = vrot.slane %v685_v5, %v675_v63  ;;  %v676_v8 = vrot.slane %v668_v6, %v675_v63  ;;  %v683_v9 = vrot.slane %v669_v32, %v675_v63 }
 0x173   : > { %v700_v10 = vcombine.low %v676_v8, %v692_v44  ;;  %v701_v11 = vcombine.high %v676_v8, %v692_v44  ;;  %v716_v12 = vcombine.low %v683_v9, %v699_v7  ;;  %v717_v15 = vcombine.high %v683_v9, %v699_v7 }
 0x175   : > { %v715_v16 = vrot.slane %v701_v11, %v707_v33  ;;  %v708_v17 = vrot.slane %v700_v10, %v707_v33  ;;  %v724_v19 = vrot.slane %v716_v12, %v707_v33  ;;  %v731_v23 = vrot.slane %v717_v15, %v707_v33 }
 0x177   : > { %741 = vrot.lane.b32.xlu0 %v715_v16, %s1291_s29  ;;  %v732_v18 = vcombine.high %v708_v17, %v1285_v0  ;;  %v733_v25 = vcombine.high %v715_v16, %v1285_v0  ;;  %v734_v13 = vcombine.high %v724_v19, %v1285_v0  ;;  %v735_v14 = vcombine.high %v731_v23, %v1285_v0  ;;  %s870_s29 = sadd.s32 %s1264_s18, %s998_s15  ;;  %s1299_s18 = smov [#allocation6]  }
 0x178   : > { %s1162_s19 = sshll.u32 %s1299_s18, 4  ;;  %s1163_s19 = int_to_ptr.vmem [resolvable:$false] %s1162_s19 }
 0x179   : > { %737 = vrot.lane.b32.xlu1 %v732_v18, %s1292_s26  ;;  %s202_s26 = scalar_lea.vmem [#allocation6], %s974_s11  ;;  %s1164_s11 = scalar_lea.vmem %s1163_s19, 256 }
 0x17b   : > { %749 = vrot.lane.b32.xlu0 %v724_v19, %s1294_s4  ;;  %s874_s4 = sshll.u32 %s202_s26, 4  ;;  %s1688_s4 = int_to_ptr.vmem [resolvable:$true] %s874_s4 }
 0x17c   : > { %s1158_s28 = scalar_lea.vmem %s1688_s4, 128  ;;  %p1165_p0 = scmp.lt.s32.totalorder %s1688_s4, %s1163_s19 }
 0x17d   : > { %745 = vrot.lane.b32.xlu1 %v733_v25, %s1295_s6  ;;  %s999_s6 = sshll.u32 %s870_s29, 7  ;;  %p1159_p7 = scmp.ne.s32.totalorder %s1688_s4, %s1158_s28 }
 0x17e   : > { %p1166_p1 = scmp.lt.s32.totalorder %s1164_s11, %s1158_s28 }
 0x17f   : > { %757 = vrot.lane.b32.xlu0 %v731_v23, %s1296_s30  ;;  %p1160_p2 = pnand %p1159_p7, %p1766_p12 }
 0x180   : > { %p1167_p6 = por %p1166_p1, %p1165_p0 }
 0x181   : > { %753 = vrot.lane.b32.xlu1 %v734_v13, %s1297_s24  ;;  %p1161_p4 = pneg %p1160_p2 }
 0x183   : > { %p1168_p9 = pnand %p1167_p6, %p1161_p4 }
 0x185   : > { %761 = vrot.lane.b32.xlu1 %v735_v14, %s1298_s5  ;;  %s1693_s5 = scalar_lea.hbm %s1756_s3, %s999_s6 }
 0x1e9   : > { %v742_v24 = vpop.permute.xlu0 %741 }
 0x1eb   : > { %v738_v39 = vpop.permute.xlu1 %737 }
 0x1ec   : > { %v765_v40 = vsel %vm764_vm4, %v708_v17, %v738_v39 }
 0x1ed   : > { %v767_v41 = vsel %vm766_vm5, %v765_v40, %v742_v24  ;;  %v750_v26 = vpop.permute.xlu0 %749 }
 0x1ef   : > { %v746_v42 = vpop.permute.xlu1 %745 }
 0x1f0   : > { %v769_v34 = vsel %vm768_vm6, %v767_v41, %v746_v42 }
 0x1f1   : > { %v771_v43 = vsel %vm770_vm7, %v769_v34, %v750_v26  ;;  %v758_v46 = vpop.permute.xlu0 %757 }
 0x1f3   : > { %v754_v20 = vpop.permute.xlu1 %753 }
 0x1f4   : > { %v773_v0 = vsel %vm772_vm8, %v771_v43, %v754_v20 }
 0x1f5   : > { %v775_v47 = vsel %vm774_vm9, %v773_v0, %v758_v46 }
 0x1f7   : > { %v762_v21 = vpop.permute.xlu1 %761 }
 0x1f8   : > { %v777_v37 = vsel %vm776_vm10, %v775_v47, %v762_v21 }
 0x1f9   : > { %1006 = vmatpush3.msk.msra.mxu0 %vm783_vm11, %v777_v37 }
 0x1fa   : > { %1008 = vmatmul.mubr.msk.f32.vlgmr.msra.gmra.mrb[0].mxu0 %vm779_vm12, %v778_v48 }
 0x2cd   : > { %v853_v22 = vpop.f32.mrb[0].mxu0 }
 0x2ce   : > { %857 = vst [vmem:[%s202_s26] sm:$0xff] %v853_v22  ;;  %v1009_v49 = vpop.f32.mrb[1].mxu0 }
 0x2cf   : > { %1171 = shalt.err (!%p1168_p9)
}
 0x2d0   : > { %s1172_s27 = scalar_lea.hbm %s1693_s5, 128  ;;  %s1176_s26 = scalar_lea.hbm %s1756_s3, 512 }
 0x2d1   : > { %p1173_p3 = scmp.ne.s32.totalorder %s1693_s5, %s1172_s27  ;;  %p1177_p5 = scmp.lt.u32.totalorder %s1693_s5, %s1756_s3 }
 0x2d2   : > { %p1178_p8 = scmp.lt.u32.totalorder %s1176_s26, %s1172_s27  ;;  %p1180_p7 = scmp.lt.u32.totalorder %s1172_s27, %s1693_s5 }
 0x2d3   : > { %p1174_p11 = pnand %p1173_p3, %p1766_p12 }
 0x2d4   : > { %p1179_p10 = por %p1178_p8, %p1177_p5 }
 0x2d5   : > { %p1175_p13 = pneg %p1174_p11 }
 0x2d6   : > { %p1181_p2 = por %p1180_p7, %p1179_p10 }
 0x2d8   : > { %p1182_p4 = pnand %p1181_p2, %p1175_p13 }
 0x2da   : > { %1185 = shalt.err (!%p1182_p4)
}
 0x2db   : > { %1012 = dma.vmem_to_hbm [thread:$0]  (%p1766_p12), %s1688_s4, 128, %s1693_s5, %s859_s23  }
 0x2dc PF: > { %p1023_p0 = scmp.ge.s32.totalorder %s1280_s22, 2  ;;  %s886_s24 = sand.u32 1, %s1240_s12  }
 0x2dd   : > { %p1767_p1 = scmp.ne.s32.totalorder %s1763_s10, 0  ;;  %s887_s28 = scalar_lea.sflag [#allocation5], %s886_s24 }
 0x2df   : > { %p1019_p6 = pnand %p1023_p0, %p1767_p1 }
 0x2e1   : > { %1235 = dma.done.wait (!%p1019_p6), %s887_s28, 128  }
 0x2e2   : > { %1237 = vsyncadd (!%p1019_p6), %s887_s28, 4294967168  ;;  %s19_s22 = sadd.s32 1, %s1280_s22   ;;  %s1768_s7 = sld [smem:[#allocation9_spill]] }
 0x2e3   : > { %p16_p9 = scmp.ge.s32.totalorder %s19_s22, 6   ;;  %s1769_s12 = smov %s1244_s13 }
 0x2e4   : > { %s1770_s13 = smov %s1248_s14  ;;  %s1771_s14 = smov %s1410_s9 }
 0x2e5   : > { %s1772_s15 = smov %s1256_s16  ;;  %s1773_s16 = smov %s1260_s17 }
 0x2e6   : > { %s1774_s17 = smov %s1407_s8  ;;  %s1775_s18 = smov %s1272_s20 }
 0x2e7   : > { %s1776_s19 = smov %s1276_s21  ;;  %s1777_s20 = smov %s1780_s25 }
 0x2e8   : > { %s1778_s21 = smov %s1768_s7  ;;  %18 = sbr.rel (!%p16_p9) target bundleno = 9 (0x9), region = 80 }
 0x2ef   :  { %892 = vsyncpa [#allocation4], 1 }
 0x2f0   :  { %894 = vsyncpa [#allocation4 + $0x1], 1 }
 0x2f1   :  { %895 = vsyncpa [#allocation5], 1 }
 0x2f2   :  { %897 = vsyncpa [#allocation5 + $0x1], 1 }

</bundles_post_ra>
